<compile_context>
chip_gen: v7x
topology: tpu7x:2x2x1
jax: 0.10.0
libtpu: 0.0.40
codegen_flags: <defaults>
</compile_context>

<pallas_src>
import functools
import math

import jax
import jax.numpy as jnp
from jax.experimental import pallas as pl
from jax.experimental.pallas import tpu as pltpu

BN_EPS = 1e-5
_MIB = 1 << 20
_VMEM_LIMIT_BYTES = 56 * _MIB        # raise scoped VMEM limit (safe on v5e/v6e/v7x)
_FUSED_VMEM_BUDGET = 40 * _MIB       # working set (incl. resident y slab) for fused path
_TWO_PHASE_VMEM_BUDGET = 24 * _MIB   # working set for the streaming fallback


def _round_up(x, m):
    return ((x + m - 1) // m) * m


def _cdiv(a, b):
    return (a + b - 1) // b


# ----------------------------------------------------------------------------
# Fused path: one pallas_call, grid = (2 phases, n batch tiles).
# ----------------------------------------------------------------------------
def fused_kernel(x_ref, w_ref, g_ref, b_ref, o_ref,
                 y_slab, stats_ref, fold_ref, *, tn, n_rows):
    p = pl.program_id(0)   # 0: matmul + stats into VMEM slab, 1: normalize + affine
    i = pl.program_id(1)   # batch tile
    row0 = pl.multiple_of(i * tn, tn)

    @pl.when(p == 0)
    def _():
        @pl.when(i == 0)
        def _():
            stats_ref[...] = jnp.zeros_like(stats_ref)

        # y = x @ W (bias cancelled exactly by the BN mean subtraction).
        y = jnp.dot(x_ref[...], w_ref[...], preferred_element_type=jnp.float32)
        y_slab[pl.ds(row0, tn), :] = y.astype(y_slab.dtype)
        # Separate row updates (no sublane concat -> no XLU relayout).
        stats_ref[0:1, :] += jnp.sum(y, axis=0, keepdims=True)
        stats_ref[1:2, :] += jnp.sum(y * y, axis=0, keepdims=True)

    @pl.when(p == 1)
    def _():
        @pl.when(i == 0)
        def _():
            # Fold BN into (scale, shift) once; hoisted out of the per-tile loop.
            inv_n = 1.0 / n_rows
            mean = stats_ref[0:1, :] * inv_n
            var = jnp.maximum(stats_ref[1:2, :] * inv_n - mean * mean, 0.0)
            scale = g_ref[...] * jax.lax.rsqrt(var + BN_EPS)
            fold_ref[0:1, :] = scale
            fold_ref[1:2, :] = b_ref[...] - mean * scale

        y = y_slab[pl.ds(row0, tn), :].astype(jnp.float32)
        o_ref[...] = (y * fold_ref[0:1, :] + fold_ref[1:2, :]).astype(o_ref.dtype)


# ----------------------------------------------------------------------------
# Fallback path: two pallas_calls, y streamed through HBM (bf16 by default).
# ----------------------------------------------------------------------------
def linear_stats_kernel(x_ref, w_ref, y_ref, stats_ref):
    @pl.when(pl.program_id(0) == 0)
    def _():
        stats_ref[...] = jnp.zeros_like(stats_ref)

    y = jnp.dot(x_ref[...], w_ref[...], preferred_element_type=jnp.float32)
    y_ref[...] = y.astype(y_ref.dtype)
    stats_ref[0:1, :] += jnp.sum(y, axis=0, keepdims=True)
    stats_ref[1:2, :] += jnp.sum(y * y, axis=0, keepdims=True)


def bn_apply_kernel(y_ref, scale_ref, shift_ref, o_ref):
    # Single FMA pass; scale/shift pre-folded outside the per-tile loop.
    o_ref[...] = (y_ref[...].astype(jnp.float32) * scale_ref[...]
                  + shift_ref[...]).astype(o_ref.dtype)


# ----------------------------------------------------------------------------
# Wrapper
# ----------------------------------------------------------------------------
def feature_block_forward(x, w_t, gamma, beta, *, tile_n=512, compute_dtype=None,
                          y_dtype=jnp.bfloat16,
                          max_fused_vmem_bytes=_FUSED_VMEM_BUDGET):
    """x: (N, D); w_t: (D, L) (Linear weight pre-transposed); gamma, beta: (1, L) or (L,).

    Returns (N, L) f32. Bias is intentionally not an input: it is mathematically
    cancelled by the training-mode BatchNorm mean subtraction.
    """
    N, D = x.shape
    L = w_t.shape[1]
    f32 = jnp.float32
    cdt = f32 if compute_dtype is None else compute_dtype
    csize = jnp.dtype(cdt).itemsize

    Lp = _round_up(L, 128)                       # lane-dense feature dim

    # Tail-aware batch tile: minimize dead padded rows while staying near tile_n.
    n_tiles = max(1, _cdiv(N, tile_n))
    tn = _round_up(_cdiv(N, n_tiles), 8)

    def fused_bytes(tn_):
        np_ = _round_up(N, tn_)
        return (np_ * Lp * 4                     # resident y slab
                + 4 * Lp * 4                     # stats + folded scale/shift scratch
                + 2 * tn_ * D * csize            # x double-buffer
                + 2 * D * Lp * csize             # weight buffers
                + 2 * 2 * Lp * 4                 # gamma / beta
                + 2 * tn_ * Lp * 4)              # output double-buffer

    def two_phase_bytes(tn_):
        ysz = jnp.dtype(y_dtype).itemsize
        return (2 * tn_ * D * csize + 2 * D * Lp * csize
                + 2 * tn_ * Lp * ysz             # y double-buffer
                + 2 * tn_ * Lp * 4               # o double-buffer
                + 8 * Lp * 4)

    use_fused = fused_bytes(tn) <= max_fused_vmem_bytes
    if not use_fused:
        # Keep the streaming working set within budget (e.g. v7x 64 MiB physical VMEM).
        while tn > 8 and two_phase_bytes(tn) > _TWO_PHASE_VMEM_BUDGET:
            tn = max(8, _round_up(tn // 2, 8))

    Np = _round_up(N, tn)
    n_tiles = Np // tn

    # Conditional padding: only materialize padded copies when actually needed.
    # Padded rows/cols stay exactly zero end-to-end (bias dropped, so stats unaffected).
    x_c = x.astype(cdt)
    x_p = x_c if Np == N else jnp.zeros((Np, D), cdt).at[:N, :].set(x_c)
    w_c = w_t.astype(cdt)
    w_p = w_c if Lp == L else jnp.zeros((D, Lp), cdt).at[:, :L].set(w_c)
    g2 = gamma.reshape(1, L).astype(f32)
    b2 = beta.reshape(1, L).astype(f32)
    g_p = g2 if Lp == L else jnp.zeros((1, Lp), f32).at[:, :L].set(g2)
    b_p = b2 if Lp == L else jnp.zeros((1, Lp), f32).at[:, :L].set(b2)

    if use_fused:
        # Single fused call; y never leaves VMEM.
        out_p = pl.pallas_call(
            functools.partial(fused_kernel, tn=tn, n_rows=float(N)),
            out_shape=jax.ShapeDtypeStruct((Np, Lp), f32),
            grid=(2, n_tiles),
            in_specs=[
                # x is only needed in pass 0; collapse its index during pass 1.
                pl.BlockSpec((tn, D), lambda p, i: (i * (1 - p), 0)),
                pl.BlockSpec((D, Lp), lambda p, i: (0, 0)),   # weights resident
                pl.BlockSpec((1, Lp), lambda p, i: (0, 0)),   # gamma resident
                pl.BlockSpec((1, Lp), lambda p, i: (0, 0)),   # beta resident
            ],
            # Collapsed to block 0 during pass 0 -> no stale output writeback.
            out_specs=pl.BlockSpec((tn, Lp), lambda p, i: (i * p, 0)),
            scratch_shapes=[
                pltpu.VMEM((Np, Lp), f32),   # resident y slab (no HBM round-trip)
                pltpu.VMEM((2, Lp), f32),    # column sum / sumsq accumulator
                pltpu.VMEM((2, Lp), f32),    # folded scale / shift
            ],
            compiler_params=pltpu.CompilerParams(
                dimension_semantics=("arbitrary", "arbitrary"),
                vmem_limit_bytes=_VMEM_LIMIT_BYTES),
        )(x_p, w_p, g_p, b_p)
    else:
        # Phase 1: tiled matmul + stats accumulation (reduction axis -> "arbitrary").
        y, stats = pl.pallas_call(
            linear_stats_kernel,
            out_shape=(jax.ShapeDtypeStruct((Np, Lp), y_dtype),
                       jax.ShapeDtypeStruct((2, Lp), f32)),
            grid=(n_tiles,),
            in_specs=[pl.BlockSpec((tn, D), lambda i: (i, 0)),
                      pl.BlockSpec((D, Lp), lambda i: (0, 0))],
            out_specs=(pl.BlockSpec((tn, Lp), lambda i: (i, 0)),
                       pl.BlockSpec((2, Lp), lambda i: (0, 0))),
            compiler_params=pltpu.CompilerParams(
                dimension_semantics=("arbitrary",),
                vmem_limit_bytes=_VMEM_LIMIT_BYTES),
        )(x_p, w_p)

        # Fold BN once outside the per-tile loop (tiny (1, Lp) math, f32).
        inv_n = 1.0 / float(N)
        mean = stats[0:1, :] * inv_n
        var = jnp.maximum(stats[1:2, :] * inv_n - mean * mean, 0.0)
        scale = g_p * jax.lax.rsqrt(var + BN_EPS)
        shift = b_p - mean * scale

        # Phase 2: single FMA epilogue per tile; independent tiles -> "parallel".
        out_p = pl.pallas_call(
            bn_apply_kernel,
            out_shape=jax.ShapeDtypeStruct((Np, Lp), f32),
            grid=(n_tiles,),
            in_specs=[pl.BlockSpec((tn, Lp), lambda i: (i, 0)),
                      pl.BlockSpec((1, Lp), lambda i: (0, 0)),
                      pl.BlockSpec((1, Lp), lambda i: (0, 0))],
            out_specs=pl.BlockSpec((tn, Lp), lambda i: (i, 0)),
            compiler_params=pltpu.CompilerParams(
                dimension_semantics=("parallel",),
                vmem_limit_bytes=_VMEM_LIMIT_BYTES),
        )(y, scale, shift)

    if Np == N and Lp == L:
        return out_p
    return out_p[:N, :L]


# ----------------------------------------------------------------------------
# Init + reference (matches PyTorch weights_init_kaiming behaviour)
# ----------------------------------------------------------------------------
def init_params(key, input_dim, low_dim):
    k_w, k_g = jax.random.split(key, 2)
    # Linear: kaiming_normal_(a=0, mode='fan_out') -> std = sqrt(2 / out_features)
    std_w = math.sqrt(2.0 / low_dim)
    w = jax.random.normal(k_w, (low_dim, input_dim), jnp.float32) * std_w  # PyTorch (out, in)
    b = jnp.zeros((1, low_dim), jnp.float32)                               # init.zeros_
    # BatchNorm1d: weight ~ N(1.0, 0.01), bias = 0
    gamma = 1.0 + 0.01 * jax.random.normal(k_g, (1, low_dim), jnp.float32)
    beta = jnp.zeros((1, low_dim), jnp.float32)
    return w.T, b, gamma, beta   # weight stored transposed as (D, L)


def reference_forward(x, w_t, b, gamma, beta):
    y = x @ w_t + b
    mean = jnp.mean(y, axis=0, keepdims=True)
    var = jnp.mean((y - mean) ** 2, axis=0, keepdims=True)
    return (y - mean) / jnp.sqrt(var + BN_EPS) * gamma + beta


if __name__ == "__main__":
    # Case 1: original small shapes (single tile, fused path).
    k_x, k_p = jax.random.split(jax.random.PRNGKey(0))
    N, input_dim, low_dim = 8, 32, 16
    x = jax.random.normal(k_x, (N, input_dim), jnp.float32)
    w_t, b, gamma, beta = init_params(k_p, input_dim, low_dim)

    out = jax.block_until_ready(feature_block_forward(x, w_t, gamma, beta))
    ref = reference_forward(x, w_t, b, gamma, beta)
    assert out.shape == (N, low_dim)
    assert jnp.allclose(out, ref, atol=1e-4, rtol=1e-4), "mismatch vs reference (small)"

    # Case 2: multi-tile fused path with batch/feature padding (exercises accumulator
    # across tiles and the tail-aware tile size: N=1100 -> tn=368, Np=1104).
    k_x2, k_p2 = jax.random.split(jax.random.PRNGKey(1))
    N2, input_dim2, low_dim2 = 1100, 32, 200
    x2 = jax.random.normal(k_x2, (N2, input_dim2), jnp.float32)
    w_t2, b2, gamma2, beta2 = init_params(k_p2, input_dim2, low_dim2)

    out2 = jax.block_until_ready(feature_block_forward(x2, w_t2, gamma2, beta2))
    ref2 = reference_forward(x2, w_t2, b2, gamma2, beta2)
    assert out2.shape == (N2, low_dim2)
    assert jnp.allclose(out2, ref2, atol=1e-3, rtol=1e-3), "mismatch vs reference (fused tiled)"

    # Case 3: force the streaming two-phase fallback with an f32 y intermediate.
    out3 = jax.block_until_ready(feature_block_forward(
        x2, w_t2, gamma2, beta2, max_fused_vmem_bytes=0, y_dtype=jnp.float32))
    assert jnp.allclose(out3, ref2, atol=1e-3, rtol=1e-3), "mismatch vs reference (two-phase f32)"

    # Case 4: fallback with default bf16 y intermediate (looser tolerance).
    out4 = jax.block_until_ready(feature_block_forward(
        x2, w_t2, gamma2, beta2, max_fused_vmem_bytes=0))
    assert jnp.allclose(out4, ref2, atol=3e-2, rtol=3e-2), "mismatch vs reference (two-phase bf16)"

    print("KERNEL_OK")
</pallas_src>

<mosaic_0001>
module attributes {stable_mosaic.version = 11 : i64} {
  func.func @fused_kernel(%arg0: i32, %arg1: i32, %arg2: memref<8x32xf32, #tpu.memory_space<vmem>>, %arg3: memref<32x128xf32, #tpu.memory_space<vmem>>, %arg4: memref<1x128xf32, #tpu.memory_space<vmem>>, %arg5: memref<1x128xf32, #tpu.memory_space<vmem>>, %arg6: memref<8x128xf32, #tpu.memory_space<vmem>>, %arg7: memref<8x128xf32, #tpu.memory_space<vmem>>, %arg8: memref<2x128xf32, #tpu.memory_space<vmem>>, %arg9: memref<2x128xf32, #tpu.memory_space<vmem>>) attributes {dimension_semantics = [#tpu.dimension_semantics<arbitrary>, #tpu.dimension_semantics<arbitrary>], iteration_bounds = array<i64: 2, 1>, scalar_prefetch = 0 : i64, scratch_operands = 3 : i64, tpu.core_type = #tpu.core_type<tc>, window_params = [{transform_indices = @transform_0, window_bounds = array<i64: 8, 32>}, {pipeline_mode = #tpu.pipeline_mode<synchronous>, transform_indices = @transform_1, window_bounds = array<i64: 32, 128>}, {pipeline_mode = #tpu.pipeline_mode<synchronous>, transform_indices = @transform_2, window_bounds = array<i64: 1, 128>}, {pipeline_mode = #tpu.pipeline_mode<synchronous>, transform_indices = @transform_3, window_bounds = array<i64: 1, 128>}, {transform_indices = @transform_4, window_bounds = array<i64: 8, 128>}]} {
    %c8_i32 = arith.constant 8 : i32
    %0 = arith.muli %arg1, %c8_i32 : i32
    %1 = tpu.assume_multiple %0, 8 : i32
    %c0_i32 = arith.constant 0 : i32
    %2 = arith.cmpi eq, %arg0, %c0_i32 : i32
    %3 = arith.extui %2 : i1 to i32
    %c0_i32_0 = arith.constant 0 : i32
    %4 = arith.cmpi ne, %3, %c0_i32_0 : i32
    scf.if %4 {
      %c0_i32_2 = arith.constant 0 : i32
      %8 = arith.cmpi eq, %arg1, %c0_i32_2 : i32
      %9 = arith.extui %8 : i1 to i32
      %c0_i32_3 = arith.constant 0 : i32
      %10 = arith.cmpi ne, %9, %c0_i32_3 : i32
      scf.if %10 {
        %cst_17 = arith.constant 0.000000e+00 : f32
        %27 = vector.broadcast %cst_17 : f32 to vector<2x128xf32>
        %c0_18 = arith.constant 0 : index
        %c0_19 = arith.constant 0 : index
        %28 = vector.load %arg8[%c0_18, %c0_19] : memref<2x128xf32, #tpu.memory_space<vmem>>, vector<2x128xf32>
        tpu.vector_store %arg8[%c0_18, %c0_19], %27 {strides = array<i32>} : memref<2x128xf32, #tpu.memory_space<vmem>>, vector<2x128xf32>,
      } else {
      }
      %c0 = arith.constant 0 : index
      %c0_4 = arith.constant 0 : index
      %11 = vector.load %arg2[%c0, %c0_4] : memref<8x32xf32, #tpu.memory_space<vmem>>, vector<8x32xf32>
      %c0_5 = arith.constant 0 : index
      %c0_6 = arith.constant 0 : index
      %12 = vector.load %arg3[%c0_5, %c0_6] : memref<32x128xf32, #tpu.memory_space<vmem>>, vector<32x128xf32>
      %cst = arith.constant dense<0.000000e+00> : vector<8x128xf32>
      %13 = tpu.matmul %11, %12, %cst {dimension_numbers = #tpu.dot_dimension_numbers<[1], [0], [0], [1], [0, 0, 1, 1], [], []>} : vector<8x32xf32>, vector<32x128xf32>, vector<8x128xf32> -> vector<8x128xf32>
      %14 = arith.index_cast %1 : i32 to index
      %c0_7 = arith.constant 0 : index
      %15 = vector.load %arg7[%14, %c0_7] : memref<8x128xf32, #tpu.memory_space<vmem>>, vector<8x128xf32>
      tpu.vector_store %arg7[%14, %c0_7], %13 {strides = array<i32>} : memref<8x128xf32, #tpu.memory_space<vmem>>, vector<8x128xf32>,
      %c0_8 = arith.constant 0 : index
      %c0_9 = arith.constant 0 : index
      %16 = vector.load %arg8[%c0_8, %c0_9] : memref<2x128xf32, #tpu.memory_space<vmem>>, vector<1x128xf32>
      %cst_10 = arith.constant dense<0.000000e+00> : vector<128xf32>
      %17 = vector.multi_reduction <add>, %13, %cst_10 [0] : vector<8x128xf32> to vector<128xf32>
      %18 = vector.shape_cast %17 : vector<128xf32> to vector<1x128xf32>
      %19 = arith.addf %16, %18 : vector<1x128xf32>
      %c0_11 = arith.constant 0 : index
      %c0_12 = arith.constant 0 : index
      %20 = vector.load %arg8[%c0_11, %c0_12] : memref<2x128xf32, #tpu.memory_space<vmem>>, vector<1x128xf32>
      tpu.vector_store %arg8[%c0_11, %c0_12], %19 {strides = array<i32>} : memref<2x128xf32, #tpu.memory_space<vmem>>, vector<1x128xf32>,
      %c1 = arith.constant 1 : index
      %c0_13 = arith.constant 0 : index
      %21 = vector.load %arg8[%c1, %c0_13] : memref<2x128xf32, #tpu.memory_space<vmem>>, vector<1x128xf32>
      %22 = arith.mulf %13, %13 : vector<8x128xf32>
      %cst_14 = arith.constant dense<0.000000e+00> : vector<128xf32>
      %23 = vector.multi_reduction <add>, %22, %cst_14 [0] : vector<8x128xf32> to vector<128xf32>
      %24 = vector.shape_cast %23 : vector<128xf32> to vector<1x128xf32>
      %25 = arith.addf %21, %24 : vector<1x128xf32>
      %c1_15 = arith.constant 1 : index
      %c0_16 = arith.constant 0 : index
      %26 = vector.load %arg8[%c1_15, %c0_16] : memref<2x128xf32, #tpu.memory_space<vmem>>, vector<1x128xf32>
      tpu.vector_store %arg8[%c1_15, %c0_16], %25 {strides = array<i32>} : memref<2x128xf32, #tpu.memory_space<vmem>>, vector<1x128xf32>,
    } else {
    }
    %c1_i32 = arith.constant 1 : i32
    %5 = arith.cmpi eq, %arg0, %c1_i32 : i32
    %6 = arith.extui %5 : i1 to i32
    %c0_i32_1 = arith.constant 0 : i32
    %7 = arith.cmpi ne, %6, %c0_i32_1 : i32
    scf.if %7 {
      %c0_i32_2 = arith.constant 0 : i32
      %8 = arith.cmpi eq, %arg1, %c0_i32_2 : i32
      %9 = arith.extui %8 : i1 to i32
      %c0_i32_3 = arith.constant 0 : i32
      %10 = arith.cmpi ne, %9, %c0_i32_3 : i32
      scf.if %10 {
        %c0_9 = arith.constant 0 : index
        %c0_10 = arith.constant 0 : index
        %20 = vector.load %arg8[%c0_9, %c0_10] : memref<2x128xf32, #tpu.memory_space<vmem>>, vector<1x128xf32>
        %cst = arith.constant 1.250000e-01 : f32
        %21 = vector.broadcast %cst : f32 to vector<1x128xf32>
        %22 = arith.mulf %20, %21 : vector<1x128xf32>
        %c1_11 = arith.constant 1 : index
        %c0_12 = arith.constant 0 : index
        %23 = vector.load %arg8[%c1_11, %c0_12] : memref<2x128xf32, #tpu.memory_space<vmem>>, vector<1x128xf32>
        %cst_13 = arith.constant 1.250000e-01 : f32
        %24 = vector.broadcast %cst_13 : f32 to vector<1x128xf32>
        %25 = arith.mulf %23, %24 : vector<1x128xf32>
        %26 = arith.mulf %22, %22 : vector<1x128xf32>
        %27 = arith.subf %25, %26 : vector<1x128xf32>
        %cst_14 = arith.constant 0.000000e+00 : f32
        %28 = vector.broadcast %cst_14 : f32 to vector<1x128xf32>
        %29 = arith.maximumf %27, %28 : vector<1x128xf32>
        %c0_15 = arith.constant 0 : index
        %c0_16 = arith.constant 0 : index
        %30 = vector.load %arg4[%c0_15, %c0_16] : memref<1x128xf32, #tpu.memory_space<vmem>>, vector<1x128xf32>
        %cst_17 = arith.constant 9.99999974E-6 : f32
        %31 = vector.broadcast %cst_17 : f32 to vector<1x128xf32>
        %32 = arith.addf %29, %31 : vector<1x128xf32>
        %33 = math.rsqrt %32 : vector<1x128xf32>
        %34 = arith.mulf %30, %33 : vector<1x128xf32>
        %c0_18 = arith.constant 0 : index
        %c0_19 = arith.constant 0 : index
        %35 = vector.load %arg9[%c0_18, %c0_19] : memref<2x128xf32, #tpu.memory_space<vmem>>, vector<1x128xf32>
        tpu.vector_store %arg9[%c0_18, %c0_19], %34 {strides = array<i32>} : memref<2x128xf32, #tpu.memory_space<vmem>>, vector<1x128xf32>,
        %c0_20 = arith.constant 0 : index
        %c0_21 = arith.constant 0 : index
        %36 = vector.load %arg5[%c0_20, %c0_21] : memref<1x128xf32, #tpu.memory_space<vmem>>, vector<1x128xf32>
        %37 = arith.mulf %22, %34 : vector<1x128xf32>
        %38 = arith.subf %36, %37 : vector<1x128xf32>
        %c1_22 = arith.constant 1 : index
        %c0_23 = arith.constant 0 : index
        %39 = vector.load %arg9[%c1_22, %c0_23] : memref<2x128xf32, #tpu.memory_space<vmem>>, vector<1x128xf32>
        tpu.vector_store %arg9[%c1_22, %c0_23], %38 {strides = array<i32>} : memref<2x128xf32, #tpu.memory_space<vmem>>, vector<1x128xf32>,
      } else {
      }
      %11 = arith.index_cast %1 : i32 to index
      %c0 = arith.constant 0 : index
      %12 = vector.load %arg7[%11, %c0] : memref<8x128xf32, #tpu.memory_space<vmem>>, vector<8x128xf32>
      %c0_4 = arith.constant 0 : index
      %c0_5 = arith.constant 0 : index
      %13 = vector.load %arg9[%c0_4, %c0_5] : memref<2x128xf32, #tpu.memory_space<vmem>>, vector<1x128xf32>
      %14 = vector.broadcast %13 : vector<1x128xf32> to vector<8x128xf32>
      %15 = arith.mulf %12, %14 : vector<8x128xf32>
      %c1 = arith.constant 1 : index
      %c0_6 = arith.constant 0 : index
      %16 = vector.load %arg9[%c1, %c0_6] : memref<2x128xf32, #tpu.memory_space<vmem>>, vector<1x128xf32>
      %17 = vector.broadcast %16 : vector<1x128xf32> to vector<8x128xf32>
      %18 = arith.addf %15, %17 : vector<8x128xf32>
      %c0_7 = arith.constant 0 : index
      %c0_8 = arith.constant 0 : index
      %19 = vector.load %arg6[%c0_7, %c0_8] : memref<8x128xf32, #tpu.memory_space<vmem>>, vector<8x128xf32>
      tpu.vector_store %arg6[%c0_7, %c0_8], %18 {strides = array<i32>} : memref<8x128xf32, #tpu.memory_space<vmem>>, vector<8x128xf32>,
    } else {
    }
    return
  }
  func.func @transform_0(%arg0: i32, %arg1: i32) -> (i32, i32) {
    %c1_i32 = arith.constant 1 : i32
    %0 = arith.subi %c1_i32, %arg0 : i32
    %1 = arith.muli %arg1, %0 : i32
    %c0_i32 = arith.constant 0 : i32
    %c0_i32_0 = arith.constant 0 : i32
    return %1, %c0_i32 : i32, i32
  }
  func.func @transform_1(%arg0: i32, %arg1: i32) -> (i32, i32) {
    %c0_i32 = arith.constant 0 : i32
    %c0_i32_0 = arith.constant 0 : i32
    %c0_i32_1 = arith.constant 0 : i32
    return %c0_i32, %c0_i32_0 : i32, i32
  }
  func.func @transform_2(%arg0: i32, %arg1: i32) -> (i32, i32) {
    %c0_i32 = arith.constant 0 : i32
    %c0_i32_0 = arith.constant 0 : i32
    %c0_i32_1 = arith.constant 0 : i32
    return %c0_i32, %c0_i32_0 : i32, i32
  }
  func.func @transform_3(%arg0: i32, %arg1: i32) -> (i32, i32) {
    %c0_i32 = arith.constant 0 : i32
    %c0_i32_0 = arith.constant 0 : i32
    %c0_i32_1 = arith.constant 0 : i32
    return %c0_i32, %c0_i32_0 : i32, i32
  }
  func.func @transform_4(%arg0: i32, %arg1: i32) -> (i32, i32) {
    %0 = arith.muli %arg1, %arg0 : i32
    %c0_i32 = arith.constant 0 : i32
    %c0_i32_0 = arith.constant 0 : i32
    return %0, %c0_i32 : i32, i32
  }
}

</mosaic_0001>

<bundles_post_ra>
// kernel: tpu_custom_call.1
= control target key start
LH: loop header
LB: loop body
LE: loop exit
PB: predicated region body
PF: predicated region fallthrough
CT: control target
= control target key end

     0   :  { %9 = vsyncpa [#allocation6], 0  ;;  %s902_s0 = inlined_call_operand.hbm [shape: f32[8,32], index: 0, kind: input, shape index: {}]   ;;  %s903_s1 = inlined_call_operand.hbm [shape: f32[32,128], index: 1, kind: input, shape index: {}]   ;;  %s904_s2 = inlined_call_operand.vmem [shape: f32[1,128], index: 2, kind: input, shape index: {}]   ;;  %s905_s3 = inlined_call_operand.vmem [shape: f32[1,128], index: 3, kind: input, shape index: {}]   ;;  %s906_s4 = inlined_call_operand.hbm [shape: f32[8,128], index: 4, kind: output, shape index: {}]  }
   0x1   :  { %11 = vsyncpa [#allocation6 + $0x1], 0 }
   0x2   :  { %12 = vsyncpa [#allocation9], 0 }
   0x3   :  { %13 = vsyncpa [#allocation7], 0 }
   0x4   :  { %15 = vsyncpa [#allocation7 + $0x1], 0  ;;  %s764_s15 = smov 0   ;;  %s766_s16 = smov 0  }
   0x5   :  { %s768_s17 = smov 0  }
   0x6 LB: > { %s507_s18 = sadd.s32 4294967295, %s729_s17   ;;  %s508_s19 = sadd.s32 4294967294, %s729_s17   ;;  %s729_s17 = sphi %s768_s17, %s21_s17   ;;  %s725_s16 = sphi %s766_s16, %s921_s16   ;;  %s721_s15 = sphi %s764_s15, %s920_s15  }
   0x7   : > { %s33_s20 = sadd.s32 1, %s725_s16  ;;  %p509_p0 = scmp.ge.s32.totalorder %s729_s17, 1 }
   0x8   : > { %p35_p1 = scmp.ge.s32.totalorder %s33_s20, 2  ;;  %p159_p2 = scmp.lt.s32.totalorder %s729_s17, 3 }
   0x9   : > { %p786_p3 = scmp.eq.s32.totalorder %s507_s18, 0  ;;  %s731_s23 = smov [#allocation8]  }
   0xa   : > { %s923_s20 = smov (%p35_p1, %s33_s20), 0  ;;  %p792_p4 = pnand %p509_p0, %p159_p2 }
   0xb   : > { %s910_s21 = scalar_select %p786_p3, 1, 0 }
   0xc   : > { %s911_s22 = scalar_select %p792_p4, 1, 0 }
   0xd   : > { %s171_s24 = sshll.u32 %s731_s23, 4  ;;  %p559_p5 = pneg %p792_p4  ;;  %s172_s24 = int_to_ptr.vmem [resolvable:$true] %s171_s24 }
   0xe   : > { %s613_s28 = scalar_lea.hbm %s903_s1, 512 }
   0xf   : > { %p801_p7 = pnand %p786_p3, %p559_p5  ;;  %p614_p10 = scmp.ne.s32.totalorder %s903_s1, %s613_s28 }
  0x10   : > { %p620_p0 = scmp.lt.u32.totalorder %s613_s28, %s903_s1 }
  0x11   : > { %p615_p11 = pneg %p801_p7 }
  0x13   : > { %p616_p12 = pnand %p615_p11, %p614_p10 }
  0x15   : > { %p617_p13 = pneg %p616_p12 }
  0x17   : > { %p622_p1 = pnand %p620_p0, %p617_p13 }
  0x19   : > { %625 = shalt.err (!%p622_p1)
}
  0x1a   : > { %s626_s7 = scalar_lea.vmem %s172_s24, 512  ;;  %p634_p9 = scmp.lt.s32.totalorder %s172_s24, %s172_s24 }
  0x1b   : > { %p627_p2 = scmp.ne.s32.totalorder %s172_s24, %s626_s7  ;;  %p635_p8 = scmp.lt.s32.totalorder %s626_s7, %s626_s7 }
  0x1d   : > { %p629_p5 = pnand %p627_p2, %p615_p11  ;;  %p636_p3 = por %p635_p8, %p634_p9 }
  0x1f   : > { %p630_p6 = pneg %p629_p5 }
  0x21   : > { %p637_p4 = pnand %p636_p3, %p630_p6 }
  0x23   : > { %640 = shalt.err (!%p637_p4)
}
  0x24   : > { %s732_s8 = smov 128   ;;  %s733_s9 = smov 8  }
  0x25   : > { %562 = dma.hbm_to_vmem [thread:$0]  (!%p801_p7), %s903_s1, 512, %s172_s24, [#allocation9], %s732_s8, %s732_s8, %s733_s9  }
  0x26   : > { %s734_s12 = smov [#allocation5]   ;;  %p913_p10 = scmp.lt.s32.totalorder %s729_s17, 2 }
  0x27   : > { %s204_s13 = sshll.u32 %s734_s12, 4  ;;  %p914_p11 = scmp.eq.s32.totalorder %s729_s17, 0  ;;  %s205_s13 = int_to_ptr.vmem [resolvable:$true] %s204_s13 }
  0x28   : > { %s641_s27 = scalar_lea.hbm %s902_s0, 128 }
  0x29   : > { %p827_p12 = pnand %p914_p11, %p913_p10  ;;  %p642_p3 = scmp.ne.s32.totalorder %s902_s0, %s641_s27 }
  0x2a   : > { %p648_p8 = scmp.lt.u32.totalorder %s641_s27, %s902_s0 }
  0x2b   : > { %p643_p4 = pneg %p827_p12 }
  0x2d   : > { %p644_p6 = pnand %p643_p4, %p642_p3 }
  0x2f   : > { %p645_p7 = pneg %p644_p6 }
  0x31   : > { %p650_p9 = pnand %p648_p8, %p645_p7 }
  0x33   : > { %653 = shalt.err (!%p650_p9)
}
  0x34   : > { %s654_s30 = scalar_lea.vmem %s205_s13, 128  ;;  %s661_s5 = scalar_lea.vmem %s205_s13, 256 }
  0x35   : > { %p655_p13 = scmp.ne.s32.totalorder %s205_s13, %s654_s30  ;;  %p662_p2 = scmp.lt.s32.totalorder %s205_s13, %s205_s13 }
  0x36   : > { %p663_p5 = scmp.lt.s32.totalorder %s661_s5, %s654_s30 }
  0x37   : > { %p657_p0 = pnand %p655_p13, %p643_p4 }
  0x38   : > { %p664_p10 = por %p663_p5, %p662_p2 }
  0x39   : > { %p658_p1 = pneg %p657_p0 }
  0x3b   : > { %p665_p11 = pnand %p664_p10, %p658_p1 }
  0x3d   : > { %668 = shalt.err (!%p665_p11)
}
  0x3e   : > { %566 = dma.hbm_to_vmem [thread:$0]  (!%p827_p12), %s902_s0, 128, %s205_s13, [#allocation6]  }
  0x3f   : > { %p916_p3 = scmp.ne.s32.totalorder %s911_s22, 0 }
  0x40   : > { %p917_p6 = scmp.ne.s32.totalorder (!%p916_p3), %s910_s21, 0 }
  0x41   : > { %213 = sbr.rel (%p916_p3) target bundleno = 381 (0x17d), region = 36 }
  0x48   : > { %708 = dma.done.wait (%p917_p6), [#allocation6], 128  }
  0x49   : > { %710 = vsyncadd (%p917_p6), [#allocation6], 4294967168 }
  0x4a   : > { %712 = dma.done.wait (%p917_p6), [#allocation9], 512  }
  0x4b   : > { %714 = vsyncadd (%p917_p6), [#allocation9], 4294966784  ;;  %p516_p4 = scmp.ne.s32.totalorder %s721_s15, 0 }
  0x4c   : > { %v262_v0 = vld [vmem:[#allocation8] sm:$0xff] (!%p516_p4)  ;;  %v263_v1 = vld [vmem:[#allocation8 + $0x8] sm:$0xff] (!%p516_p4)  ;;  %v264_v2 = vld [vmem:[#allocation8 + $0x10] sm:$0xff] (!%p516_p4)  ;;  %v735_v3 = vmov (!%p516_p4), 0.0|0.0   ;;  %v736_v6 = vmov (!%p516_p4), 0.0   ;;  %vm737_vm0 = vmmov (!%p516_p4), 0  }
  0x4d   : > { %255 = sbr.rel (%p516_p4) target bundleno = 315 (0x13b), region = 48  ;;  %541 = vmatprep.subr.bf16.mxu0 (!%p516_p4), %v735_v3  ;;  %v542_v4 = vpack.c.bf16 (!%p516_p4), %v263_v1, %v262_v0  ;;  %v265_v5 = vld [vmem:[#allocation8 + $0x18] sm:$0xff] (!%p516_p4)  ;;  %260 = vst [vmem:[#allocation3] sm:$0x3] (!%p516_p4), %v736_v6  ;;  %538 = vmatprep.mubr.msk.f32.mxu0 (!%p516_p4), %vm737_vm0, %v736_v6  ;;  %v261_v8 = vld [vmem:[#allocation5] sm:$0xff] (!%p516_p4)  ;;  %vm266_vm1 = vcmask (!%p516_p4), 261120  }
  0x4e   : > { %v545_v7 = vpack.c.bf16 (!%p516_p4), %v265_v5, %v264_v2 }
  0x4f   : > { %543 = vmatpush3.bf16.msra.mxu0 (!%p516_p4), %v542_v4 }
  0x50   : > { %544 = vmatprep.subr.bf16.mxu0 (!%p516_p4), %v735_v3 }
  0x53   : > { %546 = vmatpush3.bf16.msra.mxu0 (!%p516_p4), %v545_v7 }
  0x54   : > { %v342_v21 = vld [vmem:[#allocation3] sm:$0x1]  ;;  %v351_v24 = vld [vmem:[#allocation3 + $0x1] sm:$0x1] }
  0x56   : > { %539 = vmatmul.mubr.msk.f32.vlgmr.msra.gmra.mrb[0].mxu0 %vm266_vm1, %v261_v8 }
 0x129   : > { %v336_v9 = vpop.f32.mrb[0].mxu0 }
 0x12a   : > { %341 = vst [vmem:[#allocation2] sm:$0xff] %v336_v9  ;;  %v343_v10 = vrot.slane %v336_v9, 4  ;;  %v352_v11 = vmul.f32 %v336_v9, %v336_v9  ;;  %v540_v12 = vpop.f32.mrb[1].mxu0 }
 0x12c   : > { %v344_v13 = vadd.f32 %v343_v10, %v336_v9  ;;  %v353_v14 = vrot.slane %v352_v11, 4 }
 0x12e   : > { %v345_v15 = vrot.slane %v344_v13, 2  ;;  %v354_v16 = vadd.f32 %v353_v14, %v352_v11 }
 0x130   : > { %v346_v17 = vadd.f32 %v345_v15, %v344_v13  ;;  %v355_v18 = vrot.slane %v354_v16, 2 }
 0x132   : > { %v347_v19 = vrot.slane %v346_v17, 1  ;;  %v356_v20 = vadd.f32 %v355_v18, %v354_v16 }
 0x134   : > { %v348_v22 = vadd.f32 %v347_v19, %v346_v17  ;;  %v357_v23 = vrot.slane %v356_v20, 1 }
 0x136   : > { %v349_v25 = vadd.f32 %v348_v22, %v342_v21  ;;  %v358_v26 = vadd.f32 %v357_v23, %v356_v20 }
 0x138   : > { %350 = vst [vmem:[#allocation3] sm:$0x1] %v349_v25  ;;  %v359_v27 = vadd.f32 %v358_v26, %v351_v24 }
 0x13a   : > { %360 = vst [vmem:[#allocation3 + $0x1] sm:$0x1] %v359_v27 }
 0x13b PF: > { %p518_p12 = scmp.ne.s32.totalorder %s721_s15, 1 }
 0x13c   : > { %v376_v36 = vld [vmem:[%s904_s2] sm:$0x1] (!%p518_p12) }
 0x13d   : > { %364 = sbr.rel (%p518_p12) target bundleno = 358 (0x166), region = 56  ;;  %v381_v39 = vld [vmem:[%s905_s3] sm:$0x1] (!%p518_p12) }
 0x13e   : > { %v386_v42 = vld [vmem:[#allocation2] sm:$0xff] (!%p518_p12) }
 0x13f   : > { %v369_v28 = vld [vmem:[#allocation3] sm:$0x1] (!%p518_p12) }
 0x140   : > { %v370_v30 = vmul.f32 (!%p518_p12), 0.125, %v369_v28 }
 0x141   : > { %v371_v29 = vld [vmem:[#allocation3 + $0x1] sm:$0x1] (!%p518_p12) }
 0x142   : > { %v372_v31 = vmul.f32 (!%p518_p12), 0.125, %v371_v29  ;;  %v373_v32 = vmul.f32 (!%p518_p12), %v370_v30, %v370_v30 }
 0x144   : > { %v374_v33 = vsub.f32 %v372_v31, %v373_v32 }
 0x146   : > { %v375_v34 = vmax.f32 %v374_v33, 0.0 }
 0x148   : > { %v377_v35 = vadd.f32 1e-05, %v375_v34 }
 0x14a   : > { %611 = vrsqrt.f32 %v377_v35 }
 0x154   : > { %v612_v37 = vpop.eup %611 }
 0x155   : > { %v379_v38 = vmul.f32 %v612_v37, %v376_v36 }
 0x157   : > { %380 = vst [vmem:[#allocation4] sm:$0x1] %v379_v38  ;;  %v382_v40 = vmul.f32 %v379_v38, %v370_v30 }
 0x159   : > { %v383_v41 = vsub.f32 %v381_v39, %v382_v40 }
 0x15b   : > { %384 = vst [vmem:[#allocation4 + $0x1] sm:$0x1] %v383_v41 }
 0x15e   : > { %v519_v43 = vld [vmem:[#allocation4] ss:$0 sm:$0xff] }
 0x15f   : > { %v392_v44 = vmul.f32 %v519_v43, %v386_v42 }
 0x162   : > { %v520_v45 = vld [vmem:[#allocation4 + $0x1] ss:$0 sm:$0xff] }
 0x163   : > { %v398_v46 = vadd.f32 %v520_v45, %v392_v44 }
 0x165   : > { %399 = vst [vmem:[#allocation10] sm:$0xff] %v398_v46 }
 0x166 PF: > { %p867_p7 = scmp.eq.s32.totalorder %s507_s18, 1  ;;  %s738_s10 = smov [#allocation10]  }
 0x167   : > { %s415_s11 = sshll.u32 %s738_s10, 4  ;;  %s416_s11 = int_to_ptr.vmem [resolvable:$true] %s415_s11 }
 0x168   : > { %s669_s12 = scalar_lea.vmem %s416_s11, 128  ;;  %s675_s13 = scalar_lea.vmem %s416_s11, 256 }
 0x169   : > { %p670_p8 = scmp.ne.s32.totalorder %s416_s11, %s669_s12  ;;  %p676_p0 = scmp.lt.s32.totalorder %s416_s11, %s416_s11 }
 0x16a   : > { %p677_p1 = scmp.lt.s32.totalorder %s675_s13, %s669_s12 }
 0x16b   : > { %p671_p9 = pnand %p670_p8, %p867_p7 }
 0x16c   : > { %p678_p2 = por %p677_p1, %p676_p0 }
 0x16d   : > { %p672_p13 = pneg %p671_p9 }
 0x16f   : > { %p679_p5 = pnand %p678_p2, %p672_p13 }
 0x171   : > { %682 = shalt.err (!%p679_p5)
}
 0x172   : > { %s683_s23 = scalar_lea.hbm %s906_s4, 128 }
 0x173   : > { %p684_p10 = scmp.ne.s32.totalorder %s906_s4, %s683_s23  ;;  %p689_p6 = scmp.lt.u32.totalorder %s683_s23, %s906_s4 }
 0x175   : > { %p685_p11 = pnand %p684_p10, %p867_p7 }
 0x177   : > { %p686_p3 = pneg %p685_p11 }
 0x179   : > { %p691_p4 = pnand %p689_p6, %p686_p3 }
 0x17b   : > { %694 = shalt.err (!%p691_p4)
}
 0x17c   : > { %556 = dma.vmem_to_hbm [thread:$0]  (%p867_p7), %s416_s11, 128, %s906_s4, [#allocation7]  }
 0x17d PF: > { %p578_p12 = scmp.eq.s32.totalorder %s508_s19, 1  ;;  %p919_p8 = scmp.ge.s32.totalorder %s729_s17, 2 }
 0x17f   : > { %p568_p9 = pnand %p578_p12, %p919_p8 }
 0x181   : > { %716 = dma.done.wait (!%p568_p9), [#allocation7], 128  }
 0x182   : > { %718 = vsyncadd (!%p568_p9), [#allocation7], 4294967168  ;;  %s21_s17 = sadd.s32 1, %s729_s17   ;;  %s920_s15 = smov %s725_s16 }
 0x183   : > { %p18_p13 = scmp.ge.s32.totalorder %s21_s17, 4   ;;  %s921_s16 = smov %s923_s20 }
 0x185   :  { %20 = sbr.rel (!%p18_p13) target bundleno = 6 (0x6), region = 103 }
 0x18c   :  { %433 = vsyncpa [#allocation6], 1 }
 0x18d   :  { %435 = vsyncpa [#allocation6 + $0x1], 1 }
 0x18e   :  { %436 = vsyncpa [#allocation9], 1 }
 0x18f   :  { %437 = vsyncpa [#allocation7], 1 }
 0x190   :  { %439 = vsyncpa [#allocation7 + $0x1], 1 }

</bundles_post_ra>
